<compile_context>
chip_gen: v7x
topology: tpu7x:2x2x1
jax: 0.10.0
libtpu: 0.0.40
codegen_flags: <defaults>
</compile_context>

<pallas_src>
import jax
import jax.numpy as jnp
from jax.experimental import pallas as pl
from jax.experimental.pallas import tpu as pltpu


# ----------------------------- Pallas kernel ------------------------------ #

def _silu(z):
    return z * jax.nn.sigmoid(z)


def mhdyn_kernel(
    obs_ref, act_ref,                 # (Bt, L, Dobs), (Bt, L, Dact)
    w1f_ref, w1a_ref,                 # (Dobs, 2H) = [w1o | wobs1], (Dact, 2H) = [w1a | 0]
    w2f_ref,                          # (2H, 2E) block-diag [[wvf, 0], [0, wkf]]
    wsc_ref,                          # (2E, 1)  = [0 ; qp_scaled]^T  (score vector)
    wof_ref,                          # (2E, E)  = [wo ; 0]           (out-projection)
    bh_ref,                           # (1, 2H)  = [enc_b1 | obs_b1]
    b2_ref,                           # (1, 2E)  = [bvf | bkf]
    be_ref,                           # (3, E)   rows: [bias_v @ wo ; bo ; s_b broadcast]
    out_ref,                          # (1, Bt, E)
):
    Bt, L, Dobs = obs_ref.shape
    Dact = act_ref.shape[-1]
    E = out_ref.shape[-1]
    TE = 2 * E
    N = Bt * L

    obs = obs_ref[...].reshape(N, Dobs)
    act = act_ref[...].reshape(N, Dact)

    bvwo = be_ref[0:1, :]             # bias_v already projected through wo
    bo = be_ref[1:2, :]
    s_b = be_ref[2:3, 0:1]            # (1, 1) batch-invariant bias_k score (pre-scaled)

    # Fused layer-1 for both encoders: one obs matmul + one zero-padded act matmul.
    pre = (jnp.dot(obs, w1f_ref[...], preferred_element_type=jnp.float32)
           + jnp.dot(act, w1a_ref[...], preferred_element_type=jnp.float32)
           + bh_ref[...])                                                       # (N, 2H)
    h = _silu(pre)

    # Fused (layer-2 ∘ {v,k}-projection): vpkp[:, :E] = vp, vpkp[:, E:] = kp.
    vpkp = (jnp.dot(h, w2f_ref[...], preferred_element_type=jnp.float32)
            + b2_ref[...])                                                      # (N, 2E)

    # Scores vs. the pre-projected, pre-scaled query: one flat matmul over all rows.
    s = jnp.dot(vpkp, wsc_ref[...], preferred_element_type=jnp.float32)         # (N, 1)

    vpkp3 = vpkp.reshape(Bt, L, TE)                                             # free views (L % 8 == 0)
    s3 = s.reshape(Bt, L, 1)

    # Softmax over the L projected keys + the appended (un-projected) bias_k key,
    # without materializing the concat; s_b is hoisted (parameter-only).
    m = jnp.maximum(jnp.max(s3, axis=1, keepdims=True), s_b)                    # (Bt, 1, 1)
    e3 = jnp.exp(s3 - m)                                                        # (Bt, L, 1)
    eb = jnp.exp(s_b - m)                                                       # (Bt, 1, 1)
    denom = jnp.sum(e3, axis=1, keepdims=True) + eb                             # (Bt, 1, 1)

    # Attention-weighted sum; the kp half is zeroed by wof in the next matmul.
    ctx = jnp.sum(vpkp3 * e3, axis=1)                                           # (Bt, 2E)

    num = jnp.dot(ctx, wof_ref[...], preferred_element_type=jnp.float32)        # (Bt, E)
    num = num + eb.reshape(Bt, 1) * bvwo                                        # bias_v key path (through wo)
    out = num / denom.reshape(Bt, 1) + bo                                       # (Bt, E)

    # avg_l1_norm: x / clamp(mean(|x|, -1), 1e-8)   (exact division: keep 1e-4 budget)
    norm = jnp.maximum(jnp.mean(jnp.abs(out), axis=-1, keepdims=True), 1e-8)
    out_ref[...] = (out / norm).reshape(1, Bt, E)


# ------------------------------- wrapper ----------------------------------- #

def _full_spec(arr):
    ndim = arr.ndim
    return pl.BlockSpec(arr.shape, lambda b, _n=ndim: (0,) * _n)


def _choose_block_b(B, L, target_rows=4096):
    """Largest batch block keeping <= target_rows flattened MXU rows per grid step,
    while leaving >= 2 grid steps when the batch allows it (so both v7x TensorCores /
    megacore halves get work under dimension_semantics=("parallel",))."""
    bb = max(1, min(B, target_rows // max(L, 1)))
    half = (B + 1) // 2
    if B >= 2 and bb > half:
        bb = half
    return bb


def mhdyn_encoder_forward(observations, actions, params, block_b=None, target_rows=4096):
    """observations: (B, L, Dobs), actions: (B, L, Dact)  ->  (B, E) float32."""
    B, L, Dobs = observations.shape
    Dact = actions.shape[-1]
    H = params["enc_w1"].shape[-1]
    E = params["query"].shape[-1]

    if block_b is None:
        block_b = _choose_block_b(B, L, target_rows)
    block_b = int(block_b)

    # Pad B up to a multiple of block_b (no degenerate block_b=1 fallback); padded
    # rows produce finite garbage that is sliced off below.
    num_blocks = -(-B // block_b)
    B_pad = num_blocks * block_b
    if B_pad != B:
        pad = B_pad - B
        observations = jnp.pad(observations, ((0, pad), (0, 0), (0, 0)))
        actions = jnp.pad(actions, ((0, pad), (0, 0), (0, 0)))

    hp = jax.lax.Precision.HIGHEST
    f32 = jnp.float32

    # ---- batch-invariant fusions, computed once outside the kernel -------- #
    w1o = params["enc_w1"][:Dobs]                           # (Dobs, H)
    w1a = params["enc_w1"][Dobs:]                           # (Dact, H)

    # fused layer-1: [encoder | obs_encoder] columns side-by-side
    w1f = jnp.concatenate([w1o, params["obs_w1"]], axis=1)                        # (Dobs, 2H)
    w1a_f = jnp.concatenate([w1a, jnp.zeros((Dact, H), f32)], axis=1)             # (Dact, 2H)
    bh = jnp.concatenate([params["enc_b1"], params["obs_b1"]], axis=1)            # (1, 2H)

    # fused (layer-2 ∘ v/k-proj), block-diagonal so one push yields [vp | kp]
    wvf = jnp.dot(params["enc_w2"], params["wv"], precision=hp)                   # (H, E)
    wkf = jnp.dot(params["obs_w2"], params["wk"], precision=hp)                   # (H, E)
    zHE = jnp.zeros((H, E), f32)
    w2f = jnp.concatenate(
        [jnp.concatenate([wvf, zHE], axis=1),
         jnp.concatenate([zHE, wkf], axis=1)], axis=0)                            # (2H, 2E)
    bvf = jnp.dot(params["enc_b2"], params["wv"], precision=hp) + params["bv"]    # (1, E)
    bkf = jnp.dot(params["obs_b2"], params["wk"], precision=hp) + params["bk"]    # (1, E)
    b2 = jnp.concatenate([bvf, bkf], axis=1)                                      # (1, 2E)

    # query in-projection + softmax scale, lifted to the [vp | kp] layout
    qp = (jnp.dot(params["query"], params["wq"], precision=hp) + params["bq"]) \
         * (1.0 / jnp.sqrt(jnp.float32(E)))                                       # (1, E)
    wsc = jnp.concatenate([jnp.zeros((1, E), f32), qp], axis=1).T                 # (2E, 1)
    s_b = jnp.sum(qp * params["bias_k"])                                          # scalar (bias_k key score)

    # out-projection lifted to the [vp | kp] layout; bias_v path pre-projected
    wof = jnp.concatenate([params["wo"], jnp.zeros((E, E), f32)], axis=0)         # (2E, E)
    bvwo = jnp.dot(params["bias_v"], params["wo"], precision=hp)                  # (1, E)

    be = jnp.concatenate([bvwo, params["bo"], jnp.full((1, E), s_b, f32)], axis=0)  # (3, E)

    weights = [w1f, w1a_f, w2f, wsc, wof, bh, b2, be]

    in_specs = [
        pl.BlockSpec((block_b, L, Dobs), lambda b: (b, 0, 0)),
        pl.BlockSpec((block_b, L, Dact), lambda b: (b, 0, 0)),
    ] + [_full_spec(w) for w in weights]

    # Per-step VMEM footprint estimate: lane-padded f32 inputs (x2 double-buffer)
    # plus the (N, 2H)/(N, 2E) temporaries; set the scoped limit explicitly so the
    # 16 MiB v5e default never gates the pipeline, capped below v7x's 64 MiB.
    rows = block_b * L
    per_step = rows * 128 * 4 * (2 * 2 + 3) + (2 << 20)
    vmem_limit = int(min(56 << 20, max(32 << 20, 2 * per_step)))

    out = pl.pallas_call(
        mhdyn_kernel,
        grid=(num_blocks,),
        in_specs=in_specs,
        out_specs=pl.BlockSpec((1, block_b, E), lambda b: (b, 0, 0)),
        out_shape=jax.ShapeDtypeStruct((num_blocks, block_b, E), jnp.float32),
        compiler_params=pltpu.CompilerParams(
            dimension_semantics=("parallel",),
            vmem_limit_bytes=vmem_limit),
    )(observations, actions, *weights)

    return out.reshape(B_pad, E)[:B]


# ---------------------------- pure-JAX reference --------------------------- #

def mhdyn_reference(observations, actions, params):
    inp = jnp.concatenate([observations, actions], axis=-1)                  # (B, L, Din)
    h = _silu(inp @ params["enc_w1"] + params["enc_b1"])
    value = h @ params["enc_w2"] + params["enc_b2"]                          # (B, L, E)
    h2 = _silu(observations @ params["obs_w1"] + params["obs_b1"])
    key = h2 @ params["obs_w2"] + params["obs_b2"]                           # (B, L, E)

    qp = params["query"] @ params["wq"] + params["bq"]                       # (1, E)
    kp = key @ params["wk"] + params["bk"]                                   # (B, L, E)
    vp = value @ params["wv"] + params["bv"]                                 # (B, L, E)

    # append un-projected bias_k / bias_v rows (add_bias_kv=True)
    B = key.shape[0]
    kp = jnp.concatenate([kp, jnp.broadcast_to(params["bias_k"][None], (B, 1, kp.shape[-1]))], axis=1)
    vp = jnp.concatenate([vp, jnp.broadcast_to(params["bias_v"][None], (B, 1, vp.shape[-1]))], axis=1)

    E = qp.shape[-1]
    scores = jnp.einsum("qe,bke->bqk", qp, kp) / jnp.sqrt(jnp.float32(E))    # (B, 1, L+1)
    attn = jax.nn.softmax(scores, axis=-1)
    ctx = jnp.einsum("bqk,bke->bqe", attn, vp)                               # (B, 1, E)
    out = ctx @ params["wo"] + params["bo"]                                  # (B, 1, E)
    out = out[:, 0, :]
    norm = jnp.maximum(jnp.mean(jnp.abs(out), axis=-1, keepdims=True), 1e-8)
    return out / norm


# ---------------------------------- main ----------------------------------- #

def _make_params(key, obs_dim, act_dim, hidden, dyn_dim):
    # Deterministic synthetic parameters.  Linear weights are stored already
    # transposed ((in, out)) so the kernel computes x @ W + b.
    keys = jax.random.split(key, 32)
    ki = iter(keys)

    def w(shape, scale=0.2):
        return (scale * jax.random.normal(next(ki), shape)).astype(jnp.float32)

    din = obs_dim + act_dim
    return {
        "enc_w1": w((din, hidden)),      "enc_b1": w((1, hidden)),
        "enc_w2": w((hidden, dyn_dim)),  "enc_b2": w((1, dyn_dim)),
        "obs_w1": w((obs_dim, hidden)),  "obs_b1": w((1, hidden)),
        "obs_w2": w((hidden, dyn_dim)),  "obs_b2": w((1, dyn_dim)),
        "query":  w((1, dyn_dim), 1.0),  # nn.Parameter(torch.randn(1, 1, dyn_dim)), only_last -> (1, E)
        "wq": w((dyn_dim, dyn_dim)), "bq": w((1, dyn_dim)),
        "wk": w((dyn_dim, dyn_dim)), "bk": w((1, dyn_dim)),
        "wv": w((dyn_dim, dyn_dim)), "bv": w((1, dyn_dim)),
        "bias_k": w((1, dyn_dim)),   "bias_v": w((1, dyn_dim)),
        "wo": w((dyn_dim, dyn_dim)), "bo": w((1, dyn_dim)),
    }


if __name__ == "__main__":
    B, L = 2, 8          # batch, trajectory length
    OBS, ACT = 16, 4     # observation / action dims (inp_keys = obs + act)
    HID, E = 32, 32      # encoder hidden width, dyn_dim

    root = jax.random.PRNGKey(0)
    k_obs, k_act, k_par = jax.random.split(root, 3)
    observations = jax.random.normal(k_obs, (B, L, OBS), dtype=jnp.float32)
    actions = jax.random.normal(k_act, (B, L, ACT), dtype=jnp.float32)
    params = _make_params(k_par, OBS, ACT, HID, E)

    out = mhdyn_encoder_forward(observations, actions, params)
    out = jax.block_until_ready(out)

    ref = jax.block_until_ready(mhdyn_reference(observations, actions, params))
    assert out.shape == (B, E)
    assert jnp.allclose(out, ref, rtol=1e-4, atol=1e-4), (
        f"max abs err = {float(jnp.max(jnp.abs(out - ref)))}")

    print("KERNEL_OK")
</pallas_src>

<mosaic_0001>
module attributes {stable_mosaic.version = 11 : i64} {
  func.func @mhdyn_kernel(%arg0: i32, %arg1: memref<1x8x16xf32, #tpu.memory_space<vmem>>, %arg2: memref<1x8x4xf32, #tpu.memory_space<vmem>>, %arg3: memref<16x64xf32, #tpu.memory_space<vmem>>, %arg4: memref<4x64xf32, #tpu.memory_space<vmem>>, %arg5: memref<64x64xf32, #tpu.memory_space<vmem>>, %arg6: memref<64x1xf32, #tpu.memory_space<vmem>>, %arg7: memref<64x32xf32, #tpu.memory_space<vmem>>, %arg8: memref<1x64xf32, #tpu.memory_space<vmem>>, %arg9: memref<1x64xf32, #tpu.memory_space<vmem>>, %arg10: memref<3x32xf32, #tpu.memory_space<vmem>>, %arg11: memref<1x1x32xf32, #tpu.memory_space<vmem>>) attributes {dimension_semantics = [#tpu.dimension_semantics<parallel>], iteration_bounds = array<i64: 2>, scalar_prefetch = 0 : i64, scratch_operands = 0 : i64, tpu.core_type = #tpu.core_type<tc>, window_params = [{transform_indices = @transform_0, window_bounds = array<i64: 1, 8, 16>}, {transform_indices = @transform_1, window_bounds = array<i64: 1, 8, 4>}, {pipeline_mode = #tpu.pipeline_mode<synchronous>, transform_indices = @transform_2, window_bounds = array<i64: 16, 64>}, {pipeline_mode = #tpu.pipeline_mode<synchronous>, transform_indices = @transform_3, window_bounds = array<i64: 4, 64>}, {pipeline_mode = #tpu.pipeline_mode<synchronous>, transform_indices = @transform_4, window_bounds = array<i64: 64, 64>}, {pipeline_mode = #tpu.pipeline_mode<synchronous>, transform_indices = @transform_5, window_bounds = array<i64: 64, 1>}, {pipeline_mode = #tpu.pipeline_mode<synchronous>, transform_indices = @transform_6, window_bounds = array<i64: 64, 32>}, {pipeline_mode = #tpu.pipeline_mode<synchronous>, transform_indices = @transform_7, window_bounds = array<i64: 1, 64>}, {pipeline_mode = #tpu.pipeline_mode<synchronous>, transform_indices = @transform_8, window_bounds = array<i64: 1, 64>}, {pipeline_mode = #tpu.pipeline_mode<synchronous>, transform_indices = @transform_9, window_bounds = array<i64: 3, 32>}, {transform_indices = @transform_10, window_bounds = array<i64: 1, 1, 32>}]} {
    %c0 = arith.constant 0 : index
    %c0_0 = arith.constant 0 : index
    %c0_1 = arith.constant 0 : index
    %0 = vector.load %arg1[%c0, %c0_0, %c0_1] : memref<1x8x16xf32, #tpu.memory_space<vmem>>, vector<1x8x16xf32>
    %1 = vector.shape_cast %0 : vector<1x8x16xf32> to vector<8x16xf32>
    %c0_2 = arith.constant 0 : index
    %c0_3 = arith.constant 0 : index
    %c0_4 = arith.constant 0 : index
    %2 = vector.load %arg2[%c0_2, %c0_3, %c0_4] : memref<1x8x4xf32, #tpu.memory_space<vmem>>, vector<1x8x4xf32>
    %3 = vector.shape_cast %2 : vector<1x8x4xf32> to vector<8x4xf32>
    %c0_5 = arith.constant 0 : index
    %c0_6 = arith.constant 0 : index
    %4 = vector.load %arg10[%c0_5, %c0_6] : memref<3x32xf32, #tpu.memory_space<vmem>>, vector<1x32xf32>
    %c1 = arith.constant 1 : index
    %c0_7 = arith.constant 0 : index
    %5 = vector.load %arg10[%c1, %c0_7] : memref<3x32xf32, #tpu.memory_space<vmem>>, vector<1x32xf32>
    %c2 = arith.constant 2 : index
    %c0_8 = arith.constant 0 : index
    %6 = vector.load %arg10[%c2, %c0_8] : memref<3x32xf32, #tpu.memory_space<vmem>>, vector<1x1xf32>
    %c0_9 = arith.constant 0 : index
    %c0_10 = arith.constant 0 : index
    %7 = vector.load %arg3[%c0_9, %c0_10] : memref<16x64xf32, #tpu.memory_space<vmem>>, vector<16x64xf32>
    %cst = arith.constant dense<0.000000e+00> : vector<8x64xf32>
    %8 = tpu.matmul %1, %7, %cst {dimension_numbers = #tpu.dot_dimension_numbers<[1], [0], [0], [1], [0, 0, 1, 1], [], []>} : vector<8x16xf32>, vector<16x64xf32>, vector<8x64xf32> -> vector<8x64xf32>
    %c0_11 = arith.constant 0 : index
    %c0_12 = arith.constant 0 : index
    %9 = vector.load %arg4[%c0_11, %c0_12] : memref<4x64xf32, #tpu.memory_space<vmem>>, vector<4x64xf32>
    %cst_13 = arith.constant dense<0.000000e+00> : vector<8x64xf32>
    %10 = tpu.matmul %3, %9, %cst_13 {dimension_numbers = #tpu.dot_dimension_numbers<[1], [0], [0], [1], [0, 0, 1, 1], [], []>} : vector<8x4xf32>, vector<4x64xf32>, vector<8x64xf32> -> vector<8x64xf32>
    %11 = arith.addf %8, %10 : vector<8x64xf32>
    %c0_14 = arith.constant 0 : index
    %c0_15 = arith.constant 0 : index
    %12 = vector.load %arg8[%c0_14, %c0_15] : memref<1x64xf32, #tpu.memory_space<vmem>>, vector<1x64xf32>
    %13 = vector.broadcast %12 : vector<1x64xf32> to vector<8x64xf32>
    %14 = arith.addf %11, %13 : vector<8x64xf32>
    %15 = arith.negf %14 : vector<8x64xf32>
    %16 = math.exp %15 : vector<8x64xf32>
    %cst_16 = arith.constant 1.000000e+00 : f32
    %17 = vector.broadcast %cst_16 : f32 to vector<8x64xf32>
    %18 = arith.addf %17, %16 : vector<8x64xf32>
    %19 = arith.divf %17, %18 : vector<8x64xf32>
    %20 = arith.mulf %14, %19 : vector<8x64xf32>
    %c0_17 = arith.constant 0 : index
    %c0_18 = arith.constant 0 : index
    %21 = vector.load %arg5[%c0_17, %c0_18] : memref<64x64xf32, #tpu.memory_space<vmem>>, vector<64x64xf32>
    %cst_19 = arith.constant dense<0.000000e+00> : vector<8x64xf32>
    %22 = tpu.matmul %20, %21, %cst_19 {dimension_numbers = #tpu.dot_dimension_numbers<[1], [0], [0], [1], [0, 0, 1, 1], [], []>} : vector<8x64xf32>, vector<64x64xf32>, vector<8x64xf32> -> vector<8x64xf32>
    %c0_20 = arith.constant 0 : index
    %c0_21 = arith.constant 0 : index
    %23 = vector.load %arg9[%c0_20, %c0_21] : memref<1x64xf32, #tpu.memory_space<vmem>>, vector<1x64xf32>
    %24 = vector.broadcast %23 : vector<1x64xf32> to vector<8x64xf32>
    %25 = arith.addf %22, %24 : vector<8x64xf32>
    %c0_22 = arith.constant 0 : index
    %c0_23 = arith.constant 0 : index
    %26 = vector.load %arg6[%c0_22, %c0_23] : memref<64x1xf32, #tpu.memory_space<vmem>>, vector<64x1xf32>
    %cst_24 = arith.constant dense<0.000000e+00> : vector<8x1xf32>
    %27 = tpu.matmul %25, %26, %cst_24 {dimension_numbers = #tpu.dot_dimension_numbers<[1], [0], [0], [1], [0, 0, 1, 1], [], []>} : vector<8x64xf32>, vector<64x1xf32>, vector<8x1xf32> -> vector<8x1xf32>
    %28 = vector.shape_cast %25 : vector<8x64xf32> to vector<1x8x64xf32>
    %29 = vector.shape_cast %27 : vector<8x1xf32> to vector<1x8x1xf32>
    %cst_25 = arith.constant dense<0xFF800000> : vector<1x1xf32>
    %30 = vector.multi_reduction <maximumf>, %29, %cst_25 [1] : vector<1x8x1xf32> to vector<1x1xf32>
    %31 = vector.shape_cast %30 : vector<1x1xf32> to vector<1x1x1xf32>
    %32 = vector.shape_cast %6 : vector<1x1xf32> to vector<1x1x1xf32>
    %33 = arith.maximumf %31, %32 : vector<1x1x1xf32>
    %34 = vector.broadcast %33 : vector<1x1x1xf32> to vector<1x8x1xf32>
    %35 = arith.subf %29, %34 : vector<1x8x1xf32>
    %36 = math.exp %35 : vector<1x8x1xf32>
    %37 = vector.shape_cast %6 : vector<1x1xf32> to vector<1x1x1xf32>
    %38 = arith.subf %37, %33 : vector<1x1x1xf32>
    %39 = math.exp %38 : vector<1x1x1xf32>
    %cst_26 = arith.constant dense<0.000000e+00> : vector<1x1xf32>
    %40 = vector.multi_reduction <add>, %36, %cst_26 [1] : vector<1x8x1xf32> to vector<1x1xf32>
    %41 = vector.shape_cast %40 : vector<1x1xf32> to vector<1x1x1xf32>
    %42 = arith.addf %41, %39 : vector<1x1x1xf32>
    %43 = vector.broadcast %36 : vector<1x8x1xf32> to vector<1x8x64xf32>
    %44 = arith.mulf %28, %43 : vector<1x8x64xf32>
    %cst_27 = arith.constant dense<0.000000e+00> : vector<1x64xf32>
    %45 = vector.multi_reduction <add>, %44, %cst_27 [1] : vector<1x8x64xf32> to vector<1x64xf32>
    %c0_28 = arith.constant 0 : index
    %c0_29 = arith.constant 0 : index
    %46 = vector.load %arg7[%c0_28, %c0_29] : memref<64x32xf32, #tpu.memory_space<vmem>>, vector<64x32xf32>
    %cst_30 = arith.constant dense<0.000000e+00> : vector<1x32xf32>
    %47 = tpu.matmul %45, %46, %cst_30 {dimension_numbers = #tpu.dot_dimension_numbers<[1], [0], [0], [1], [0, 0, 1, 1], [], []>} : vector<1x64xf32>, vector<64x32xf32>, vector<1x32xf32> -> vector<1x32xf32>
    %48 = vector.shape_cast %39 : vector<1x1x1xf32> to vector<1x1xf32>
    %49 = vector.broadcast %48 : vector<1x1xf32> to vector<1x32xf32>
    %50 = arith.mulf %49, %4 : vector<1x32xf32>
    %51 = arith.addf %47, %50 : vector<1x32xf32>
    %52 = vector.shape_cast %42 : vector<1x1x1xf32> to vector<1x1xf32>
    %53 = vector.broadcast %52 : vector<1x1xf32> to vector<1x32xf32>
    %54 = arith.divf %51, %53 : vector<1x32xf32>
    %55 = arith.addf %54, %5 : vector<1x32xf32>
    %56 = math.absf %55 : vector<1x32xf32>
    %cst_31 = arith.constant dense<0.000000e+00> : vector<1xf32>
    %57 = vector.multi_reduction <add>, %56, %cst_31 [1] : vector<1x32xf32> to vector<1xf32>
    %58 = vector.shape_cast %57 : vector<1xf32> to vector<1x1xf32>
    %cst_32 = arith.constant 3.200000e+01 : f32
    %59 = vector.broadcast %cst_32 : f32 to vector<1x1xf32>
    %60 = arith.divf %58, %59 : vector<1x1xf32>
    %cst_33 = arith.constant 9.99999993E-9 : f32
    %61 = vector.broadcast %cst_33 : f32 to vector<1x1xf32>
    %62 = arith.maximumf %60, %61 : vector<1x1xf32>
    %63 = vector.broadcast %62 : vector<1x1xf32> to vector<1x32xf32>
    %64 = arith.divf %55, %63 : vector<1x32xf32>
    %65 = vector.shape_cast %64 : vector<1x32xf32> to vector<1x1x32xf32>
    %c0_34 = arith.constant 0 : index
    %c0_35 = arith.constant 0 : index
    %c0_36 = arith.constant 0 : index
    %66 = vector.load %arg11[%c0_34, %c0_35, %c0_36] : memref<1x1x32xf32, #tpu.memory_space<vmem>>, vector<1x1x32xf32>
    tpu.vector_store %arg11[%c0_34, %c0_35, %c0_36], %65 {strides = array<i32>} : memref<1x1x32xf32, #tpu.memory_space<vmem>>, vector<1x1x32xf32>,
    return
  }
  func.func @transform_0(%arg0: i32) -> (i32, i32, i32) {
    %c0_i32 = arith.constant 0 : i32
    %c0_i32_0 = arith.constant 0 : i32
    %c0_i32_1 = arith.constant 0 : i32
    return %arg0, %c0_i32, %c0_i32_0 : i32, i32, i32
  }
  func.func @transform_1(%arg0: i32) -> (i32, i32, i32) {
    %c0_i32 = arith.constant 0 : i32
    %c0_i32_0 = arith.constant 0 : i32
    %c0_i32_1 = arith.constant 0 : i32
    return %arg0, %c0_i32, %c0_i32_0 : i32, i32, i32
  }
  func.func @transform_2(%arg0: i32) -> (i32, i32) {
    %c0_i32 = arith.constant 0 : i32
    %c0_i32_0 = arith.constant 0 : i32
    %c0_i32_1 = arith.constant 0 : i32
    return %c0_i32, %c0_i32_0 : i32, i32
  }
  func.func @transform_3(%arg0: i32) -> (i32, i32) {
    %c0_i32 = arith.constant 0 : i32
    %c0_i32_0 = arith.constant 0 : i32
    %c0_i32_1 = arith.constant 0 : i32
    return %c0_i32, %c0_i32_0 : i32, i32
  }
  func.func @transform_4(%arg0: i32) -> (i32, i32) {
    %c0_i32 = arith.constant 0 : i32
    %c0_i32_0 = arith.constant 0 : i32
    %c0_i32_1 = arith.constant 0 : i32
    return %c0_i32, %c0_i32_0 : i32, i32
  }
  func.func @transform_5(%arg0: i32) -> (i32, i32) {
    %c0_i32 = arith.constant 0 : i32
    %c0_i32_0 = arith.constant 0 : i32
    %c0_i32_1 = arith.constant 0 : i32
    return %c0_i32, %c0_i32_0 : i32, i32
  }
  func.func @transform_6(%arg0: i32) -> (i32, i32) {
    %c0_i32 = arith.constant 0 : i32
    %c0_i32_0 = arith.constant 0 : i32
    %c0_i32_1 = arith.constant 0 : i32
    return %c0_i32, %c0_i32_0 : i32, i32
  }
  func.func @transform_7(%arg0: i32) -> (i32, i32) {
    %c0_i32 = arith.constant 0 : i32
    %c0_i32_0 = arith.constant 0 : i32
    %c0_i32_1 = arith.constant 0 : i32
    return %c0_i32, %c0_i32_0 : i32, i32
  }
  func.func @transform_8(%arg0: i32) -> (i32, i32) {
    %c0_i32 = arith.constant 0 : i32
    %c0_i32_0 = arith.constant 0 : i32
    %c0_i32_1 = arith.constant 0 : i32
    return %c0_i32, %c0_i32_0 : i32, i32
  }
  func.func @transform_9(%arg0: i32) -> (i32, i32) {
    %c0_i32 = arith.constant 0 : i32
    %c0_i32_0 = arith.constant 0 : i32
    %c0_i32_1 = arith.constant 0 : i32
    return %c0_i32, %c0_i32_0 : i32, i32
  }
  func.func @transform_10(%arg0: i32) -> (i32, i32, i32) {
    %c0_i32 = arith.constant 0 : i32
    %c0_i32_0 = arith.constant 0 : i32
    %c0_i32_1 = arith.constant 0 : i32
    return %arg0, %c0_i32, %c0_i32_0 : i32, i32, i32
  }
}

</mosaic_0001>

<bundles_post_ra>
// kernel: tpu_custom_call.1
= control target key start
LH: loop header
LB: loop body
LE: loop exit
PB: predicated region body
PF: predicated region fallthrough
CT: control target
= control target key end

     0   :  { %15 = vsyncpa [#allocation3], 0  ;;  %s1512_s0 = inlined_call_operand.vmem [shape: f32[2,8,16], index: 0, kind: input, shape index: {}]   ;;  %s1513_s1 = inlined_call_operand.vmem [shape: f32[2,8,4], index: 1, kind: input, shape index: {}]   ;;  %s1514_s2 = inlined_call_operand.vmem [shape: f32[16,64], index: 2, kind: input, shape index: {}]   ;;  %s1515_s3 = inlined_call_operand.vmem [shape: f32[4,64], index: 3, kind: input, shape index: {}]   ;;  %s1516_s4 = inlined_call_operand.vmem [shape: f32[64,64], index: 4, kind: input, shape index: {}]   ;;  %s1517_s5 = inlined_call_operand.vmem [shape: f32[64,1], index: 5, kind: input, shape index: {}]   ;;  %s1518_s6 = inlined_call_operand.vmem [shape: f32[64,32], index: 6, kind: input, shape index: {}]   ;;  %s1519_s7 = inlined_call_operand.vmem [shape: f32[1,64], index: 7, kind: input, shape index: {}]   ;;  %s1520_s8 = inlined_call_operand.vmem [shape: f32[1,64], index: 8, kind: input, shape index: {}]   ;;  %s1521_s9 = inlined_call_operand.vmem [shape: f32[3,32], index: 9, kind: input, shape index: {}]   ;;  %s1522_s10 = inlined_call_operand.hbm [shape: f32[2,1,32], index: 10, kind: output, shape index: {}]  }
   0x1   :  { %17 = vsyncpa [#allocation3 + $0x1], 0  ;;  %s1281_s13 = smov 0   ;;  %s1283_s14 = smov 0  }
   0x2   :  { %s1285_s15 = smov 0   ;;  %s1287_s16 = smov 0  }
   0x3 LB: > { %s1302_s17 = sadd.s32 4294967295, %s1219_s16   ;;  %s942_s18 = sadd.s32 4294967294, %s1219_s16   ;;  %s1219_s16 = sphi %s1287_s16, %s1528_s16   ;;  %s1215_s15 = sphi %s1285_s15, %s1527_s15   ;;  %s1211_s14 = sphi %s1283_s14, %s1526_s14   ;;  %s1207_s13 = sphi %s1281_s13, %s1525_s13  }
   0x4   : > { %s1306_s19 = sadd.s32 1, %s1219_s16   ;;  %s250_s20 = sadd.s32 1, %s1215_s15 }
   0x5   : > { %s247_s21 = ssub.s32 %s1219_s16, %s1306_s19  ;;  %p260_p0 = scmp.ne.s32.totalorder %s1215_s15, %s1211_s14 }
   0x6   : > { %p248_p1 = scmp.eq.s32.totalorder %s247_s21, 0  ;;  %p261_p2 = scmp.eq.s32.totalorder %s1302_s17, 1 }
   0x7   : > { %p266_p3 = scmp.ne.s32.totalorder %s1211_s14, %s1207_s13  ;;  %p267_p4 = scmp.eq.s32.totalorder %s942_s18, 1 }
   0x8   : > { %s1317_s22 = scalar_select %p248_p1, %s1215_s15, %s250_s20  }
   0x9   : > { %p1319_p5 = por %p261_p2, %p260_p0  ;;  %p1323_p6 = por %p267_p4, %p266_p3 }
   0xa   : > { %p945_p7 = scmp.ge.s32.totalorder %s1219_s16, 1  ;;  %p323_p8 = scmp.lt.s32.totalorder %s1219_s16, 3 }
   0xc   : > { %p324_p9 = pnand %p945_p7, %p323_p8 }
   0xd   : > { %v378_v0 = vld [vmem:[%s1515_s3] sm:$0xf] (!%p324_p9)  ;;  %vm383_vm0 = vcmask (!%p324_p9), 1043456   ;;  %v1221_v1 = vmov (!%p324_p9), 0.0   ;;  %vm1222_vm1 = vmmov (!%p324_p9), 0   ;;  %p363_p10 = scmp.lt.s32.totalorder (!%p324_p9), %s1302_s17, 1  ;;  %v725_v54 = vlaneseq (!%p324_p9) }
   0xe   : > { %327 = sbr.rel (%p324_p9) target bundleno = 1269 (0x4f5), region = 60  ;;  %992 = vmatprep.subr.mxu1 (!%p324_p9), %v1221_v1  ;;  %994 = vmatprep.mubr.msk.f32.mxu1 (!%p324_p9), %vm1222_vm1, %v1221_v1  ;;  %v376_v2 = vld [vmem:[%s1514_s2] sm:$0xff] (!%p324_p9)  ;;  %v377_v3 = vld [vmem:[%s1514_s2 + $0x8] sm:$0xff] (!%p324_p9)  ;;  %v1223_v4 = vmov (!%p324_p9), 0.0|0.0   ;;  %vm379_vm2 = vcmask (!%p324_p9), 31744   ;;  %vm457_vm3 = vcmask (!%p324_p9), 130048  }
   0xf   : > { %993 = vmatpush3.msk.msra.mxu1 (!%p324_p9), %vm383_vm0, %v378_v0  ;;  %1064 = vmatprep.subr.bf16.mxu0 (!%p324_p9), %v1223_v4  ;;  %v1062_v5 = vpack.c.bf16 (!%p324_p9), %v377_v3, %v376_v2  ;;  %v546_v8 = vld [vmem:[%s1516_s4] sm:$0xff] (!%p324_p9)  ;;  %v547_v9 = vld [vmem:[%s1516_s4 + $0x8] sm:$0xff] (!%p324_p9)  ;;  %v548_v11 = vld [vmem:[%s1516_s4 + $0x10] sm:$0xff] (!%p324_p9)  ;;  %vm561_vm4 = vcmask (!%p324_p9), 523264   ;;  %v1224_v48 = vmov (!%p324_p9), 0   ;;  %vm716_vm5 = vcmask (!%p324_p9), 7168  }
  0x10   : > { %1061 = vmatprep.subr.bf16.mxu1 (!%p324_p9), %v1223_v4  ;;  %1020 = vmatprep.mubr.msk.f32.mxu0 (!%p324_p9), %vm1222_vm1, %v1221_v1  ;;  %v1065_v10 = vpack.c.bf16 (!%p324_p9), %v547_v9, %v546_v8  ;;  %v549_v12 = vld [vmem:[%s1516_s4 + $0x18] sm:$0xff] (!%p324_p9)  ;;  %v550_v14 = vld [vmem:[%s1516_s4 + $0x20] sm:$0xff] (!%p324_p9)  ;;  %v551_v15 = vld [vmem:[%s1516_s4 + $0x28] sm:$0xff] (!%p324_p9)  ;;  %v726_v57 = vshrl.u32 (!%p324_p9), %v725_v54, 7  ;;  %vm852_vm6 = vcmask (!%p324_p9), 253952  }
  0x11   : > { %v1068_v13 = vpack.c.bf16 (!%p324_p9), %v549_v12, %v548_v11  ;;  %v1071_v16 = vpack.c.bf16 (!%p324_p9), %v551_v15, %v550_v14  ;;  %v552_v17 = vld [vmem:[%s1516_s4 + $0x30] sm:$0xff] (!%p324_p9)  ;;  %v553_v18 = vld [vmem:[%s1516_s4 + $0x38] sm:$0xff] (!%p324_p9)  ;;  %v635_v20 = vld [vmem:[%s1517_s5] sm:$0xff] (!%p324_p9)  ;;  %1144 = vset.pattern.permute.xlu1 (!%p324_p9), %v1224_v48  ;;  %1143 = vset.pattern.permute.xlu0 (!%p324_p9), %v1224_v48 }
  0x12   : > { %1066 = vmatpush3.bf16.msra.mxu0 (!%p324_p9), %v1065_v10  ;;  %v1074_v19 = vpack.c.bf16 (!%p324_p9), %v553_v18, %v552_v17  ;;  %v636_v21 = vld [vmem:[%s1517_s5 + $0x8] sm:$0xff] (!%p324_p9)  ;;  %v637_v22 = vld [vmem:[%s1517_s5 + $0x10] sm:$0xff] (!%p324_p9)  ;;  %v638_v24 = vld [vmem:[%s1517_s5 + $0x18] sm:$0xff] (!%p324_p9)  ;;  %v727_v61 = vsub.s32 (!%p324_p9), 0, %v726_v57 }
  0x13   : > { %1067 = vmatprep.subr.bf16.mxu0 (!%p324_p9), %v1223_v4  ;;  %v1077_v23 = vpack.c.bf16 (!%p324_p9), %v636_v21, %v635_v20  ;;  %v1080_v25 = vpack.c.bf16 (!%p324_p9), %v638_v24, %v637_v22  ;;  %v639_v26 = vld [vmem:[%s1517_s5 + $0x20] sm:$0xff] (!%p324_p9)  ;;  %v640_v27 = vld [vmem:[%s1517_s5 + $0x28] sm:$0xff] (!%p324_p9)  ;;  %v641_v41 = vld [vmem:[%s1517_s5 + $0x30] sm:$0xff] (!%p324_p9) }
  0x14   : > { %v1083_v28 = vpack.c.bf16 (!%p324_p9), %v640_v27, %v639_v26  ;;  %v951_v32 = vld [vmem:[%s1519_s7] ss:$0 sm:$0xff] (!%p324_p9)  ;;  %v642_v42 = vld [vmem:[%s1517_s5 + $0x38] sm:$0xff] (!%p324_p9)  ;;  %v375_v59 = vld [vmem:[%s1521_s9 + $0x2] sm:$0x1] (!%p324_p9) }
  0x15   : > { %s364_s11 = scalar_select %p363_p10, %s1302_s17, 1  ;;  %v1086_v43 = vpack.c.bf16 %v642_v42, %v641_v41  ;;  %v953_v44 = vld [vmem:[%s1520_s8] ss:$0 sm:$0xff]  ;;  %v758_v12 = vld [vmem:[%s1518_s6 + $0x10] sm:$0xff]  ;;  %v761_v18 = vld [vmem:[%s1518_s6 + $0x28] sm:$0xff] }
  0x16   : > { %1069 = vmatpush3.bf16.msra.mxu0 %v1068_v13  ;;  %v759_v13 = vld [vmem:[%s1518_s6 + $0x18] sm:$0xff]  ;;  %v760_v17 = vld [vmem:[%s1518_s6 + $0x20] sm:$0xff]  ;;  %v762_v22 = vld [vmem:[%s1518_s6 + $0x30] sm:$0xff] }
  0x17   : > { %s946_s12 = sshll.u32 %s364_s11, 3  ;;  %1070 = vmatprep.subr.bf16.mxu0 %v1223_v4  ;;  %v1092_v14 = vpack.c.bf16 %v759_v13, %v758_v12  ;;  %s361_s11 = sand.u32 1, %s1211_s14  }
  0x18   : > { %s366_s21 = scalar_lea.vmem %s1512_s0, %s946_s12  ;;  %s370_s27 = scalar_lea.vmem %s1513_s1, %s946_s12 }
  0x19   : > { %v372_v6 = vld [vmem:[%s370_s27] sm:$0xff]  ;;  %s957_s12 = sshll.u32 %s1302_s17, 4  ;;  %s362_s18 = scalar_lea.vmem [#allocation2], %s361_s11 }
  0x1a   : > { %995 = vmatmul.mubr.msk.f32.vlgmr.msra.gmra.mrb[0].mxu1 %vm379_vm2, %v372_v6  ;;  %v371_v7 = vld [vmem:[%s366_s21] sm:$0xff]  ;;  %1072 = vmatpush3.bf16.msra.mxu0 %v1071_v16  ;;  %s875_s20 = sshll.u32 %s362_s18, 4  ;;  %s1469_s26 = scalar_lea.hbm %s1522_s10, %s957_s12  ;;  %s1471_s20 = int_to_ptr.vmem [resolvable:$true] %s875_s20 }
  0x1b   : > { %1063 = vmatpush3.bf16.msra.mxu1 %v1062_v5  ;;  %1001 = vmatprep.mubr.msk.f32.mxu1 %vm1222_vm1, %v1221_v1  ;;  %v756_v6 = vld [vmem:[%s1518_s6] sm:$0xff]  ;;  %s863_s27 = scalar_lea.sflag [#allocation3], %s361_s11  ;;  %s1157_s28 = scalar_lea.vmem %s1471_s20, 16 }
  0x1c   : > { %1076 = vmatprep.subr.bf16.mxu1 %v1223_v4  ;;  %1073 = vmatprep.subr.bf16.mxu0 %v1223_v4  ;;  %p1158_p11 = scmp.ne.s32.totalorder %s1471_s20, %s1157_s28  ;;  %s1225_s17 = smov [#allocation2]  }
  0x1d   : > { %s1161_s29 = sshll.u32 %s1225_s17, 4  ;;  %s1162_s29 = int_to_ptr.vmem [resolvable:$false] %s1161_s29 }
  0x1e   : > { %1002 = vmatmul.mubr.msk.f32.vlgmr.msra.gmra.mrb[2].mxu1 %vm457_vm3, %v371_v7  ;;  %1075 = vmatpush3.bf16.msra.mxu0 %v1074_v19  ;;  %v757_v7 = vld [vmem:[%s1518_s6 + $0x8] sm:$0xff]  ;;  %v1095_v19 = vpack.c.bf16 %v761_v18, %v760_v17  ;;  %p1159_p12 = pnand %p1158_p11, %p1319_p5  ;;  %s1163_s30 = scalar_lea.vmem %s1162_s29, 32 }
  0x1f   : > { %1039 = vmatprep.mubr.msk.f32.mxu1 %vm1222_vm1, %v1221_v1  ;;  %1088 = vmatprep.subr.bf16.mxu0 %v1223_v4  ;;  %v1089_v8 = vpack.c.bf16 %v757_v7, %v756_v6  ;;  %p1164_p0 = scmp.lt.s32.totalorder %s1471_s20, %s1162_s29  ;;  %p1165_p1 = scmp.lt.s32.totalorder %s1163_s30, %s1157_s28 }
  0x20   : > { %1078 = vmatpush3.bf16.msra.mxu1 %v1077_v23  ;;  %v763_v23 = vld [vmem:[%s1518_s6 + $0x38] sm:$0xff]  ;;  %p1160_p13 = pneg %p1159_p12 }
  0x21   : > { %1079 = vmatprep.subr.bf16.mxu1 %v1223_v4  ;;  %v1098_v24 = vpack.c.bf16 %v763_v23, %v762_v22  ;;  %p1166_p2 = por %p1165_p1, %p1164_p0 }
  0x23   : > { %p1167_p3 = pnand %p1166_p2, %p1160_p13 }
  0x24   : > { %1081 = vmatpush3.bf16.msra.mxu1 %v1080_v25 }
  0x25   : > { %1082 = vmatprep.subr.bf16.mxu1 %v1223_v4 }
  0x28   : > { %1084 = vmatpush3.bf16.msra.mxu1 %v1083_v28 }
  0x29   : > { %1085 = vmatprep.subr.bf16.mxu1 %v1223_v4 }
  0x2c   : > { %1087 = vmatpush3.bf16.msra.mxu1 %v1086_v43  ;;  %v374_v43 = vld [vmem:[%s1521_s9 + $0x1] sm:$0x1] }
  0xed   : > { %v453_v29 = vpop.f32.mrb[0].mxu1 }
  0xee   : > { %v996_v30 = vpop.f32.mrb[1].mxu1 }
  0xf1   : > { %v527_v31 = vpop.f32.mrb[2].mxu1 }
  0xf2   : > { %v528_v33 = vadd.f32 %v527_v31, %v453_v29  ;;  %v1003_v34 = vpop.f32.mrb[3].mxu1 }
  0xf4   : > { %v538_v35 = vadd.f32 %v951_v32, %v528_v33 }
  0xf6   : > { %v952_v36 = vmul.f32 -1.442695, %v538_v35 }
  0xf8   : > { %1145 = vpow2.f32 %v952_v36  ;;  %v373_v36 = vld [vmem:[%s1521_s9] sm:$0x1] }
 0x102   : > { %v1146_v37 = vpop.eup %1145 }
 0x103   : > { %v542_v38 = vadd.f32 1.0, %v1146_v37 }
 0x105   : > { %1147 = vrcp.f32 %v542_v38 }
 0x10f   : > { %v1148_v39 = vpop.eup %1147 }
 0x110   : > { %v545_v40 = vmul.f32 %v1148_v39, %v538_v35 }
 0x112   : > { %1021 = vmatmul.mubr.msk.f32.vlgmr.msra.gmra.mrb[0].mxu0 %vm561_vm4, %v545_v40 }
 0x113   : > { %1058 = vmatprep.mubr.msk.f32.mxu0 %vm1222_vm1, %v1221_v1  ;;  %1090 = vmatpush3.bf16.msra.mxu0 %v1089_v8 }
 0x114   : > { %1091 = vmatprep.subr.bf16.mxu0 %v1223_v4 }
 0x117   : > { %1093 = vmatpush3.bf16.msra.mxu0 %v1092_v14 }
 0x118   : > { %1094 = vmatprep.subr.bf16.mxu0 %v1223_v4 }
 0x11b   : > { %1096 = vmatpush3.bf16.msra.mxu0 %v1095_v19 }
 0x11c   : > { %1097 = vmatprep.subr.bf16.mxu0 %v1223_v4 }
 0x11f   : > { %1099 = vmatpush3.bf16.msra.mxu0 %v1098_v24 }
 0x1e5   : > { %v631_v45 = vpop.f32.mrb[0].mxu0 }
 0x1e6   : > { %v632_v46 = vadd.f32 %v953_v44, %v631_v45  ;;  %v1022_v47 = vpop.f32.mrb[1].mxu0 }
 0x1e8   : > { %1040 = vmatmul.mubr.msk.f32.vlgmr.msra.gmra.mrb[4].mxu1 %vm561_vm4, %v632_v46 }
 0x2bb   : > { %v712_v49 = vpop.f32.mrb[4].mxu1 }
 0x2bc   : > { %v717_v50 = vsel %vm716_vm5, %v712_v49, -inf  ;;  %v1041_v51 = vpop.f32.mrb[5].mxu1 }
 0x2bd   : > { %v718_v52 = vrot.slane %v717_v50, 4 }
 0x2bf   : > { %v719_v53 = vmax.f32 %v717_v50, %v718_v52 }
 0x2c1   : > { %v720_v55 = vrot.slane %v719_v53, 2 }
 0x2c3   : > { %v721_v56 = vmax.f32 %v719_v53, %v720_v55 }
 0x2c5   : > { %v722_v58 = vrot.slane %v721_v56, 1 }
 0x2c7   : > { %v723_v60 = vmax.f32 %v721_v56, %v722_v58 }
 0x2c9   : > { %v724_v62 = vmax.f32 %v723_v60, %v375_v59 }
 0x2cb   : > { %v728_v63 = vrot.slane %v724_v62, %v727_v61  ;;  %v732_v0 = vsub.f32 %v375_v59, %v724_v62 }
 0x2cd   : > { %v729_v1 = vsub.f32 %v712_v49, %v728_v63  ;;  %v733_v2 = vmul.f32 1.442695, %v732_v0 }
 0x2cf   : > { %v730_v3 = vmul.f32 1.442695, %v729_v1  ;;  %1149 = vpow2.f32 %v733_v2 }
 0x2d1   : > { %1151 = vpow2.f32 %v730_v3 }
 0x2d9   : > { %v1150_v5 = vpop.eup %1149 }
 0x2da   : > { %766 = vperm.xlu1 %1144, %v1150_v5  }
 0x2db   : > { %v1152_v9 = vpop.eup %1151 }
 0x2dc   : > { %v735_v10 = vsel %vm716_vm5, %v1152_v9, 0.0  ;;  %745 = vperm.xlu0 %1143, %v1152_v9  }
 0x2dd   : > { %v736_v11 = vrot.slane %v735_v10, 4 }
 0x2df   : > { %v737_v15 = vadd.f32 %v736_v11, %v735_v10 }
 0x2e1   : > { %v738_v16 = vrot.slane %v737_v15, 2 }
 0x2e3   : > { %v739_v20 = vadd.f32 %v738_v16, %v737_v15 }
 0x2e5   : > { %v740_v21 = vrot.slane %v739_v20, 1 }
 0x2e7   : > { %v741_v25 = vadd.f32 %v740_v21, %v739_v20 }
 0x2e9   : > { %v742_v26 = vadd.f32 %v1150_v5, %v741_v25 }
 0x2eb   : > { %845 = vperm.xlu0 %1143, %v742_v26  }
 0x359   : > { %v767_v37 = vpop.permute.xlu1 %766 }
 0x35a   : > { %v769_v38 = vmul.f32 %v767_v37, %v373_v36 }
 0x35b   : > { %v746_v27 = vpop.permute.xlu0 %745 }
 0x35c   : > { %v748_v28 = vmul.f32 %v746_v27, %v632_v46 }
 0x35e   : > { %v749_v29 = vsel %vm561_vm4, %v748_v28, 0.0 }
 0x35f   : > { %v750_v30 = vrot.slane %v749_v29, 4 }
 0x361   : > { %v751_v31 = vadd.f32 %v750_v30, %v749_v29 }
 0x363   : > { %v752_v4 = vrot.slane %v751_v31, 2 }
 0x365   : > { %v753_v32 = vadd.f32 %v752_v4, %v751_v31 }
 0x367   : > { %v754_v33 = vrot.slane %v753_v32, 1 }
 0x369   : > { %v755_v34 = vadd.f32 %v754_v33, %v753_v32 }
 0x36a   : > { %v846_v35 = vpop.permute.xlu0 %845 }
 0x36b   : > { %1059 = vmatmul.mubr.msk.f32.vlgmr.msra.gmra.mrb[2].mxu0 %vm561_vm4, %v755_v34  ;;  %1153 = vrcp.f32 %v846_v35 }
 0x375   : > { %v1154_v42 = vpop.eup %1153 }
 0x43e   : > { %v839_v39 = vpop.f32.mrb[2].mxu0 }
 0x43f   : > { %v840_v40 = vadd.f32 %v839_v39, %v769_v38  ;;  %v1060_v41 = vpop.f32.mrb[3].mxu0 }
 0x441   : > { %v849_v44 = vmul.f32 %v1154_v42, %v840_v40 }
 0x443   : > { %v850_v45 = vadd.f32 %v849_v44, %v374_v43 }
 0x445   : > { %v851_v46 = vand.u32 2147483647, %v850_v45 }
 0x447   : > { %v853_v47 = vsel %vm852_vm6, %v851_v46, 0.0 }
 0x448   : > { %854 = vadd.xlane.f32.xlu1 %v853_v47 }
 0x4d5   : > { %v855_v48 = vpop.xlane.xlu1 %854 }
 0x4d6   : > { %v857_v49 = vmul.f32 0.03125, %v855_v48 }
 0x4d8   : > { %v858_v50 = vmax.f32 %v857_v49, 1e-08 }
 0x4da   : > { %1155 = vrcp.f32 %v858_v50 }
 0x4e4   : > { %v1156_v51 = vpop.eup %1155 }
 0x4e5   : > { %v860_v52 = vmul.f32 %v1156_v51, %v850_v45 }
 0x4e7   : > { %861 = vst.msk [vmem:[%s362_s18] sm:$0x1] %vm852_vm6, %v860_v52 }
 0x4e8   : > { %1170 = shalt.err (!%p1167_p3)
}
 0x4e9   : > { %s1171_s11 = scalar_lea.hbm %s1469_s26, 16  ;;  %s1175_s21 = scalar_lea.hbm %s1522_s10, 32 }
 0x4ea   : > { %p1172_p4 = scmp.ne.s32.totalorder %s1469_s26, %s1171_s11  ;;  %p1176_p9 = scmp.lt.u32.totalorder %s1469_s26, %s1522_s10 }
 0x4eb   : > { %p1177_p10 = scmp.lt.u32.totalorder %s1175_s21, %s1171_s11  ;;  %p1179_p12 = scmp.lt.u32.totalorder %s1171_s11, %s1469_s26 }
 0x4ec   : > { %p1173_p7 = pnand %p1172_p4, %p1319_p5 }
 0x4ed   : > { %p1178_p11 = por %p1177_p10, %p1176_p9 }
 0x4ee   : > { %p1174_p8 = pneg %p1173_p7 }
 0x4ef   : > { %p1180_p13 = por %p1179_p12, %p1178_p11 }
 0x4f1   : > { %p1181_p0 = pnand %p1180_p13, %p1174_p8 }
 0x4f3   : > { %1184 = shalt.err (!%p1181_p0)
}
 0x4f4   : > { %1100 = dma.vmem_to_hbm [thread:$0]  (%p1319_p5), %s1471_s20, 16, %s1469_s26, %s863_s27  }
 0x4f5 PF: > { %p1106_p1 = scmp.ge.s32.totalorder %s1219_s16, 2  ;;  %s887_s28 = sand.u32 1, %s1207_s13  }
 0x4f6   : > { %s888_s29 = scalar_lea.sflag [#allocation3], %s887_s28 }
 0x4f7   : > { %p1103_p2 = pnand %p1106_p1, %p1323_p6 }
 0x4f9   : > { %1202 = dma.done.wait (!%p1103_p2), %s888_s29, 16  }
 0x4fa   : > { %1204 = vsyncadd (!%p1103_p2), %s888_s29, 4294967280  ;;  %p20_p3 = scmp.ge.s32.totalorder %s1306_s19, 4   ;;  %s1525_s13 = smov %s1211_s14 }
 0x4fb   : > { %s1526_s14 = smov %s1215_s15  ;;  %s1527_s15 = smov %s1317_s22 }
 0x4fc   : > { %s1528_s16 = smov %s1306_s19  ;;  %22 = sbr.rel (!%p20_p3) target bundleno = 3 (0x3), region = 98 }
 0x503   :  { %892 = vsyncpa [#allocation3], 1 }
 0x504   :  { %894 = vsyncpa [#allocation3 + $0x1], 1 }

</bundles_post_ra>
